<compile_context>
chip_gen: v7x
topology: tpu7x:2x2x1
jax: 0.10.0
libtpu: 0.0.40
codegen_flags: <defaults>
</compile_context>

<pallas_src>
import functools

import jax
import jax.numpy as jnp
from jax import lax
from jax.experimental import pallas as pl
from jax.experimental.pallas import tpu as pltpu


def _mha_kernel(q_ref, k_ref, v_ref,
                wq_ref, wk_ref, wv_ref, wfc_ref,
                gamma_ref, beta_ref,
                out_ref, attn_ref,
                *, n_head, d_k, d_v, eps):
    """One (batch element, q-tile) per grid step.

    q_ref   : (1, tq, D)  f32      k_ref/v_ref : (1, S, D) f32
    wq/wk   : (H, D, d_k) bf16     wv : (H, D, d_v) bf16   wfc : (H, d_v, D) bf16
    gamma/beta : (1, D)   f32
    out_ref : (1, tq, D)           attn_ref : (1, H, tq, S)
    """
    tq = q_ref.shape[1]
    s_kv = k_ref.shape[1]
    d_model = q_ref.shape[2]

    q_in = q_ref[0].astype(jnp.float32)          # (tq, D) residual source (pre-LN)
    k_in = k_ref[0]                              # (S, D)
    v_in = v_ref[0]                              # (S, D)

    # --- LayerNorm on q only (f32), matching nn.LayerNorm(d_model, eps) -----
    mean = jnp.mean(q_in, axis=-1, keepdims=True)
    var = jnp.mean((q_in - mean) ** 2, axis=-1, keepdims=True)
    q_ln = (q_in - mean) * lax.rsqrt(var + eps)
    q_ln = q_ln * gamma_ref[...] + beta_ref[...]

    # --- Head-batched projections: bf16 operands, f32 accumulation ----------
    # Inputs are broadcast along a leading head axis so every matmul is a
    # canonical (batch, m, k) x (batch, k, n) MXU batched matmul — no in-kernel
    # transposes, lane-splitting reshapes or unaligned slices.
    inv_temp = 1.0 / (d_k ** 0.5)                # q / temperature folded in here
    q_b = jnp.broadcast_to((q_ln * inv_temp).astype(jnp.bfloat16),
                           (n_head, tq, d_model))
    k_b = jnp.broadcast_to(k_in.astype(jnp.bfloat16), (n_head, s_kv, d_model))
    v_b = jnp.broadcast_to(v_in.astype(jnp.bfloat16), (n_head, s_kv, d_model))

    qh = jnp.einsum('hqd,hdk->hqk', q_b, wq_ref[...],
                    preferred_element_type=jnp.float32)        # (H, tq, dk)
    kh = jnp.einsum('hsd,hdk->hsk', k_b, wk_ref[...],
                    preferred_element_type=jnp.float32)        # (H, S, dk)
    vh = jnp.einsum('hsd,hde->hse', v_b, wv_ref[...],
                    preferred_element_type=jnp.float32)        # (H, S, dv)

    # --- Scores + numerically stable softmax (f32) --------------------------
    scores = jnp.einsum('hqk,hsk->hqs', qh.astype(jnp.bfloat16),
                        kh.astype(jnp.bfloat16),
                        preferred_element_type=jnp.float32)    # (H, tq, S)
    scores = scores - jnp.max(scores, axis=-1, keepdims=True)
    p = jnp.exp(scores)
    p = p * pl.reciprocal(jnp.sum(p, axis=-1, keepdims=True), approx=True)

    # Single contiguous store of the whole (H, tq, S) probability slab.
    # TODO(synk): attention dropout is identity in eval mode.
    attn_ref[0] = p.astype(attn_ref.dtype)

    # --- P @ V, per-head fc, head-sum (== concat + fc), residual ------------
    ctx = jnp.einsum('hqs,hse->hqe', p.astype(jnp.bfloat16),
                     vh.astype(jnp.bfloat16),
                     preferred_element_type=jnp.float32)       # (H, tq, dv)
    proj = jnp.einsum('hqe,hed->hqd', ctx.astype(jnp.bfloat16), wfc_ref[...],
                      preferred_element_type=jnp.float32)      # (H, tq, D)
    o = jnp.sum(proj, axis=0)                                  # (tq, D)

    # TODO(synk): output dropout is identity in eval mode.
    out_ref[0] = (o + q_in).astype(out_ref.dtype)              # residual = pre-LN q


def multi_head_attention(q, k, v, params, *, n_head, d_k, d_v, eps=1e-6,
                         block_q=None, attn_dtype=jnp.float32,
                         vmem_limit_bytes=None):
    """q, k, v: [B, S, D] float32.  Returns (output [B,S,D], attn [B,H,S,S])."""
    B, S, D = q.shape
    wq, wk, wv, wfc, gamma, beta = params  # wq/wk: (D, H*dk), wv: (D, H*dv),
                                           # wfc: (H*dv, D), gamma/beta: (1, D)

    # Per-head weight layout, done once outside the kernel (plain XLA, free),
    # shipped in bf16 (f32 accumulation happens inside the kernel).
    wq_h = jnp.transpose(wq.reshape(D, n_head, d_k), (1, 0, 2)).astype(jnp.bfloat16)
    wk_h = jnp.transpose(wk.reshape(D, n_head, d_k), (1, 0, 2)).astype(jnp.bfloat16)
    wv_h = jnp.transpose(wv.reshape(D, n_head, d_v), (1, 0, 2)).astype(jnp.bfloat16)
    wfc_h = wfc.reshape(n_head, d_v, D).astype(jnp.bfloat16)
    gamma = gamma.astype(jnp.float32)
    beta = beta.astype(jnp.float32)

    # q-tile size: large on 128 MiB VMEM parts (v5e/v6e), keep moderate for
    # v7x (64 MiB).  Must divide S; here defaults to min(S, 512).
    if block_q is None:
        block_q = min(S, 512)
    if S % block_q != 0:
        block_q = S
    n_qt = S // block_q

    kernel = functools.partial(_mha_kernel, n_head=n_head, d_k=d_k, d_v=d_v, eps=eps)

    grid_spec = pltpu.PrefetchScalarGridSpec(
        num_scalar_prefetch=0,
        grid=(B, n_qt),
        in_specs=[
            pl.BlockSpec((1, block_q, D), lambda b, i: (b, i, 0)),          # q tile
            pl.BlockSpec((1, S, D), lambda b, i: (b, 0, 0)),                # k (full S)
            pl.BlockSpec((1, S, D), lambda b, i: (b, 0, 0)),                # v (full S)
            pl.BlockSpec((n_head, D, d_k), lambda b, i: (0, 0, 0)),         # Wq (H,D,dk)
            pl.BlockSpec((n_head, D, d_k), lambda b, i: (0, 0, 0)),         # Wk (H,D,dk)
            pl.BlockSpec((n_head, D, d_v), lambda b, i: (0, 0, 0)),         # Wv (H,D,dv)
            pl.BlockSpec((n_head, d_v, D), lambda b, i: (0, 0, 0)),         # fc (H,dv,D)
            pl.BlockSpec((1, D), lambda b, i: (0, 0)),                      # gamma
            pl.BlockSpec((1, D), lambda b, i: (0, 0)),                      # beta
        ],
        out_specs=[
            pl.BlockSpec((1, block_q, D), lambda b, i: (b, i, 0)),              # output
            pl.BlockSpec((1, n_head, block_q, S), lambda b, i: (b, 0, i, 0)),   # attn
        ],
    )

    out_shape = (
        jax.ShapeDtypeStruct((B, S, D), q.dtype),
        jax.ShapeDtypeStruct((B, n_head, S, S), attn_dtype),
    )

    cp = dict(dimension_semantics=("parallel", "parallel"))
    if vmem_limit_bytes is not None:
        cp["vmem_limit_bytes"] = vmem_limit_bytes

    return pl.pallas_call(
        kernel,
        grid_spec=grid_spec,
        out_shape=out_shape,
        compiler_params=pltpu.CompilerParams(**cp),
    )(q, k, v, wq_h, wk_h, wv_h, wfc_h, gamma, beta)


def init_params(key, d_model, n_head, d_k, d_v):
    """Deterministic synthetic params (PyTorch Linear weights, stored transposed)."""
    k1, k2, k3, k4 = jax.random.split(key, 4)
    scale = 0.05
    wq = scale * jax.random.normal(k1, (d_model, n_head * d_k), jnp.float32)
    wk = scale * jax.random.normal(k2, (d_model, n_head * d_k), jnp.float32)
    wv = scale * jax.random.normal(k3, (d_model, n_head * d_v), jnp.float32)
    wfc = scale * jax.random.normal(k4, (n_head * d_v, d_model), jnp.float32)
    gamma = jnp.ones((1, d_model), jnp.float32)   # nn.LayerNorm default weight
    beta = jnp.zeros((1, d_model), jnp.float32)   # nn.LayerNorm default bias
    return (wq, wk, wv, wfc, gamma, beta)


if __name__ == "__main__":
    B, S, D = 2, 8, 32
    H, DK, DV = 4, 8, 8

    key = jax.random.PRNGKey(0)
    kq, kk, kv, kp = jax.random.split(key, 4)
    q = jax.random.normal(kq, (B, S, D), jnp.float32)
    k = jax.random.normal(kk, (B, S, D), jnp.float32)
    v = jax.random.normal(kv, (B, S, D), jnp.float32)
    params = init_params(kp, D, H, DK, DV)

    out, attn = multi_head_attention(q, k, v, params, n_head=H, d_k=DK, d_v=DV)
    jax.block_until_ready((out, attn))

    assert out.shape == (B, S, D)
    assert attn.shape == (B, H, S, S)
    assert bool(jnp.isfinite(out).all()) and bool(jnp.isfinite(attn).all())
    print("KERNEL_OK")
</pallas_src>

<mosaic_0001>
module attributes {stable_mosaic.version = 11 : i64} {
  func.func @_mha_kernel(%arg0: i32, %arg1: i32, %arg2: memref<1x8x32xf32, #tpu.memory_space<vmem>>, %arg3: memref<1x8x32xf32, #tpu.memory_space<vmem>>, %arg4: memref<1x8x32xf32, #tpu.memory_space<vmem>>, %arg5: memref<4x32x8xbf16, #tpu.memory_space<vmem>>, %arg6: memref<4x32x8xbf16, #tpu.memory_space<vmem>>, %arg7: memref<4x32x8xbf16, #tpu.memory_space<vmem>>, %arg8: memref<4x8x32xbf16, #tpu.memory_space<vmem>>, %arg9: memref<1x32xf32, #tpu.memory_space<vmem>>, %arg10: memref<1x32xf32, #tpu.memory_space<vmem>>, %arg11: memref<1x8x32xf32, #tpu.memory_space<vmem>>, %arg12: memref<1x4x8x8xf32, #tpu.memory_space<vmem>>) attributes {dimension_semantics = [#tpu.dimension_semantics<parallel>, #tpu.dimension_semantics<parallel>], iteration_bounds = array<i64: 2, 1>, scalar_prefetch = 0 : i64, scratch_operands = 0 : i64, tpu.core_type = #tpu.core_type<tc>, window_params = [{transform_indices = @transform_0, window_bounds = array<i64: 1, 8, 32>}, {transform_indices = @transform_1, window_bounds = array<i64: 1, 8, 32>}, {transform_indices = @transform_2, window_bounds = array<i64: 1, 8, 32>}, {pipeline_mode = #tpu.pipeline_mode<synchronous>, transform_indices = @transform_3, window_bounds = array<i64: 4, 32, 8>}, {pipeline_mode = #tpu.pipeline_mode<synchronous>, transform_indices = @transform_4, window_bounds = array<i64: 4, 32, 8>}, {pipeline_mode = #tpu.pipeline_mode<synchronous>, transform_indices = @transform_5, window_bounds = array<i64: 4, 32, 8>}, {pipeline_mode = #tpu.pipeline_mode<synchronous>, transform_indices = @transform_6, window_bounds = array<i64: 4, 8, 32>}, {pipeline_mode = #tpu.pipeline_mode<synchronous>, transform_indices = @transform_7, window_bounds = array<i64: 1, 32>}, {pipeline_mode = #tpu.pipeline_mode<synchronous>, transform_indices = @transform_8, window_bounds = array<i64: 1, 32>}, {transform_indices = @transform_9, window_bounds = array<i64: 1, 8, 32>}, {transform_indices = @transform_10, window_bounds = array<i64: 1, 4, 8, 8>}]} {
    %c0 = arith.constant 0 : index
    %c0_0 = arith.constant 0 : index
    %c0_1 = arith.constant 0 : index
    %0 = vector.load %arg2[%c0, %c0_0, %c0_1] : memref<1x8x32xf32, #tpu.memory_space<vmem>>, vector<1x8x32xf32>
    %1 = vector.shape_cast %0 : vector<1x8x32xf32> to vector<8x32xf32>
    %c0_2 = arith.constant 0 : index
    %c0_3 = arith.constant 0 : index
    %c0_4 = arith.constant 0 : index
    %2 = vector.load %arg3[%c0_2, %c0_3, %c0_4] : memref<1x8x32xf32, #tpu.memory_space<vmem>>, vector<1x8x32xf32>
    %3 = vector.shape_cast %2 : vector<1x8x32xf32> to vector<8x32xf32>
    %c0_5 = arith.constant 0 : index
    %c0_6 = arith.constant 0 : index
    %c0_7 = arith.constant 0 : index
    %4 = vector.load %arg4[%c0_5, %c0_6, %c0_7] : memref<1x8x32xf32, #tpu.memory_space<vmem>>, vector<1x8x32xf32>
    %5 = vector.shape_cast %4 : vector<1x8x32xf32> to vector<8x32xf32>
    %cst = arith.constant dense<0.000000e+00> : vector<8xf32>
    %6 = vector.multi_reduction <add>, %1, %cst [1] : vector<8x32xf32> to vector<8xf32>
    %7 = vector.shape_cast %6 : vector<8xf32> to vector<8x1xf32>
    %cst_8 = arith.constant 3.200000e+01 : f32
    %8 = vector.broadcast %cst_8 : f32 to vector<8x1xf32>
    %9 = arith.divf %7, %8 : vector<8x1xf32>
    %10 = vector.broadcast %9 : vector<8x1xf32> to vector<8x32xf32>
    %11 = arith.subf %1, %10 : vector<8x32xf32>
    %12 = arith.mulf %11, %11 : vector<8x32xf32>
    %cst_9 = arith.constant dense<0.000000e+00> : vector<8xf32>
    %13 = vector.multi_reduction <add>, %12, %cst_9 [1] : vector<8x32xf32> to vector<8xf32>
    %14 = vector.shape_cast %13 : vector<8xf32> to vector<8x1xf32>
    %cst_10 = arith.constant 3.200000e+01 : f32
    %15 = vector.broadcast %cst_10 : f32 to vector<8x1xf32>
    %16 = arith.divf %14, %15 : vector<8x1xf32>
    %17 = vector.broadcast %9 : vector<8x1xf32> to vector<8x32xf32>
    %18 = arith.subf %1, %17 : vector<8x32xf32>
    %cst_11 = arith.constant 9.99999997E-7 : f32
    %19 = vector.broadcast %cst_11 : f32 to vector<8x1xf32>
    %20 = arith.addf %16, %19 : vector<8x1xf32>
    %21 = math.rsqrt %20 : vector<8x1xf32>
    %22 = vector.broadcast %21 : vector<8x1xf32> to vector<8x32xf32>
    %23 = arith.mulf %18, %22 : vector<8x32xf32>
    %c0_12 = arith.constant 0 : index
    %c0_13 = arith.constant 0 : index
    %24 = vector.load %arg9[%c0_12, %c0_13] : memref<1x32xf32, #tpu.memory_space<vmem>>, vector<1x32xf32>
    %25 = vector.broadcast %24 : vector<1x32xf32> to vector<8x32xf32>
    %26 = arith.mulf %23, %25 : vector<8x32xf32>
    %c0_14 = arith.constant 0 : index
    %c0_15 = arith.constant 0 : index
    %27 = vector.load %arg10[%c0_14, %c0_15] : memref<1x32xf32, #tpu.memory_space<vmem>>, vector<1x32xf32>
    %28 = vector.broadcast %27 : vector<1x32xf32> to vector<8x32xf32>
    %29 = arith.addf %26, %28 : vector<8x32xf32>
    %cst_16 = arith.constant 0.353553385 : f32
    %30 = vector.broadcast %cst_16 : f32 to vector<8x32xf32>
    %31 = arith.mulf %29, %30 : vector<8x32xf32>
    %32 = arith.truncf %31 : vector<8x32xf32> to vector<8x32xbf16>
    %33 = vector.shape_cast %32 : vector<8x32xbf16> to vector<1x8x32xbf16>
    %34 = vector.broadcast %33 : vector<1x8x32xbf16> to vector<4x8x32xbf16>
    %35 = arith.truncf %3 : vector<8x32xf32> to vector<8x32xbf16>
    %36 = vector.shape_cast %35 : vector<8x32xbf16> to vector<1x8x32xbf16>
    %37 = vector.broadcast %36 : vector<1x8x32xbf16> to vector<4x8x32xbf16>
    %38 = arith.truncf %5 : vector<8x32xf32> to vector<8x32xbf16>
    %39 = vector.shape_cast %38 : vector<8x32xbf16> to vector<1x8x32xbf16>
    %40 = vector.broadcast %39 : vector<1x8x32xbf16> to vector<4x8x32xbf16>
    %c0_17 = arith.constant 0 : index
    %c0_18 = arith.constant 0 : index
    %c0_19 = arith.constant 0 : index
    %41 = vector.load %arg5[%c0_17, %c0_18, %c0_19] : memref<4x32x8xbf16, #tpu.memory_space<vmem>>, vector<4x32x8xbf16>
    "tpu.trace_start"() <{level = 10 : i32, message = "hqd,hdk->hqk"}> : () -> ()
    %cst_20 = arith.constant dense<0.000000e+00> : vector<4x8x8xf32>
    %42 = tpu.matmul %34, %41, %cst_20 {dimension_numbers = #tpu.dot_dimension_numbers<[2], [1], [1], [2], [0, 0, 0, 1, 1, 2], [0], [0]>} : vector<4x8x32xbf16>, vector<4x32x8xbf16>, vector<4x8x8xf32> -> vector<4x8x8xf32>
    "tpu.trace_stop"() : () -> ()
    %c0_21 = arith.constant 0 : index
    %c0_22 = arith.constant 0 : index
    %c0_23 = arith.constant 0 : index
    %43 = vector.load %arg6[%c0_21, %c0_22, %c0_23] : memref<4x32x8xbf16, #tpu.memory_space<vmem>>, vector<4x32x8xbf16>
    "tpu.trace_start"() <{level = 10 : i32, message = "hsd,hdk->hsk"}> : () -> ()
    %cst_24 = arith.constant dense<0.000000e+00> : vector<4x8x8xf32>
    %44 = tpu.matmul %37, %43, %cst_24 {dimension_numbers = #tpu.dot_dimension_numbers<[2], [1], [1], [2], [0, 0, 0, 1, 1, 2], [0], [0]>} : vector<4x8x32xbf16>, vector<4x32x8xbf16>, vector<4x8x8xf32> -> vector<4x8x8xf32>
    "tpu.trace_stop"() : () -> ()
    %c0_25 = arith.constant 0 : index
    %c0_26 = arith.constant 0 : index
    %c0_27 = arith.constant 0 : index
    %45 = vector.load %arg7[%c0_25, %c0_26, %c0_27] : memref<4x32x8xbf16, #tpu.memory_space<vmem>>, vector<4x32x8xbf16>
    "tpu.trace_start"() <{level = 10 : i32, message = "hsd,hde->hse"}> : () -> ()
    %cst_28 = arith.constant dense<0.000000e+00> : vector<4x8x8xf32>
    %46 = tpu.matmul %40, %45, %cst_28 {dimension_numbers = #tpu.dot_dimension_numbers<[2], [1], [1], [2], [0, 0, 0, 1, 1, 2], [0], [0]>} : vector<4x8x32xbf16>, vector<4x32x8xbf16>, vector<4x8x8xf32> -> vector<4x8x8xf32>
    "tpu.trace_stop"() : () -> ()
    %47 = arith.truncf %42 : vector<4x8x8xf32> to vector<4x8x8xbf16>
    %48 = arith.truncf %44 : vector<4x8x8xf32> to vector<4x8x8xbf16>
    "tpu.trace_start"() <{level = 10 : i32, message = "hqk,hsk->hqs"}> : () -> ()
    %cst_29 = arith.constant dense<0.000000e+00> : vector<4x8x8xf32>
    %49 = tpu.matmul %47, %48, %cst_29 {dimension_numbers = #tpu.dot_dimension_numbers<[2], [2], [1], [1], [0, 0, 0, 1, 1, 1], [0], [0]>} : vector<4x8x8xbf16>, vector<4x8x8xbf16>, vector<4x8x8xf32> -> vector<4x8x8xf32>
    "tpu.trace_stop"() : () -> ()
    %cst_30 = arith.constant dense<0xFF800000> : vector<4x8xf32>
    %50 = vector.multi_reduction <maximumf>, %49, %cst_30 [2] : vector<4x8x8xf32> to vector<4x8xf32>
    %51 = vector.shape_cast %50 : vector<4x8xf32> to vector<4x8x1xf32>
    %52 = vector.broadcast %51 : vector<4x8x1xf32> to vector<4x8x8xf32>
    %53 = arith.subf %49, %52 : vector<4x8x8xf32>
    %54 = math.exp %53 : vector<4x8x8xf32>
    %cst_31 = arith.constant dense<0.000000e+00> : vector<4x8xf32>
    %55 = vector.multi_reduction <add>, %54, %cst_31 [2] : vector<4x8x8xf32> to vector<4x8xf32>
    %56 = vector.shape_cast %55 : vector<4x8xf32> to vector<4x8x1xf32>
    %57 = tpu.reciprocal %56 {approx = true} : vector<4x8x1xf32> -> vector<4x8x1xf32>
    %58 = vector.broadcast %57 : vector<4x8x1xf32> to vector<4x8x8xf32>
    %59 = arith.mulf %54, %58 : vector<4x8x8xf32>
    %c0_32 = arith.constant 0 : index
    %c0_33 = arith.constant 0 : index
    %c0_34 = arith.constant 0 : index
    %c0_35 = arith.constant 0 : index
    %60 = vector.load %arg12[%c0_32, %c0_33, %c0_34, %c0_35] : memref<1x4x8x8xf32, #tpu.memory_space<vmem>>, vector<1x4x8x8xf32>
    %61 = vector.shape_cast %60 : vector<1x4x8x8xf32> to vector<4x8x8xf32>
    %62 = vector.shape_cast %59 : vector<4x8x8xf32> to vector<1x4x8x8xf32>
    tpu.vector_store %arg12[%c0_32, %c0_33, %c0_34, %c0_35], %62 {strides = array<i32>} : memref<1x4x8x8xf32, #tpu.memory_space<vmem>>, vector<1x4x8x8xf32>,
    %63 = arith.truncf %59 : vector<4x8x8xf32> to vector<4x8x8xbf16>
    %64 = arith.truncf %46 : vector<4x8x8xf32> to vector<4x8x8xbf16>
    "tpu.trace_start"() <{level = 10 : i32, message = "hqs,hse->hqe"}> : () -> ()
    %cst_36 = arith.constant dense<0.000000e+00> : vector<4x8x8xf32>
    %65 = tpu.matmul %63, %64, %cst_36 {dimension_numbers = #tpu.dot_dimension_numbers<[2], [1], [1], [2], [0, 0, 0, 1, 1, 2], [0], [0]>} : vector<4x8x8xbf16>, vector<4x8x8xbf16>, vector<4x8x8xf32> -> vector<4x8x8xf32>
    "tpu.trace_stop"() : () -> ()
    %66 = arith.truncf %65 : vector<4x8x8xf32> to vector<4x8x8xbf16>
    %c0_37 = arith.constant 0 : index
    %c0_38 = arith.constant 0 : index
    %c0_39 = arith.constant 0 : index
    %67 = vector.load %arg8[%c0_37, %c0_38, %c0_39] : memref<4x8x32xbf16, #tpu.memory_space<vmem>>, vector<4x8x32xbf16>
    "tpu.trace_start"() <{level = 10 : i32, message = "hqe,hed->hqd"}> : () -> ()
    %cst_40 = arith.constant dense<0.000000e+00> : vector<4x8x32xf32>
    %68 = tpu.matmul %66, %67, %cst_40 {dimension_numbers = #tpu.dot_dimension_numbers<[2], [1], [1], [2], [0, 0, 0, 1, 1, 2], [0], [0]>} : vector<4x8x8xbf16>, vector<4x8x32xbf16>, vector<4x8x32xf32> -> vector<4x8x32xf32>
    "tpu.trace_stop"() : () -> ()
    %cst_41 = arith.constant dense<0.000000e+00> : vector<8x32xf32>
    %69 = vector.multi_reduction <add>, %68, %cst_41 [0] : vector<4x8x32xf32> to vector<8x32xf32>
    %70 = arith.addf %69, %1 : vector<8x32xf32>
    %c0_42 = arith.constant 0 : index
    %c0_43 = arith.constant 0 : index
    %c0_44 = arith.constant 0 : index
    %71 = vector.load %arg11[%c0_42, %c0_43, %c0_44] : memref<1x8x32xf32, #tpu.memory_space<vmem>>, vector<1x8x32xf32>
    %72 = vector.shape_cast %71 : vector<1x8x32xf32> to vector<8x32xf32>
    %73 = vector.shape_cast %70 : vector<8x32xf32> to vector<1x8x32xf32>
    tpu.vector_store %arg11[%c0_42, %c0_43, %c0_44], %73 {strides = array<i32>} : memref<1x8x32xf32, #tpu.memory_space<vmem>>, vector<1x8x32xf32>,
    return
  }
  func.func @transform_0(%arg0: i32, %arg1: i32) -> (i32, i32, i32) {
    %c0_i32 = arith.constant 0 : i32
    %c0_i32_0 = arith.constant 0 : i32
    return %arg0, %arg1, %c0_i32 : i32, i32, i32
  }
  func.func @transform_1(%arg0: i32, %arg1: i32) -> (i32, i32, i32) {
    %c0_i32 = arith.constant 0 : i32
    %c0_i32_0 = arith.constant 0 : i32
    %c0_i32_1 = arith.constant 0 : i32
    return %arg0, %c0_i32, %c0_i32_0 : i32, i32, i32
  }
  func.func @transform_2(%arg0: i32, %arg1: i32) -> (i32, i32, i32) {
    %c0_i32 = arith.constant 0 : i32
    %c0_i32_0 = arith.constant 0 : i32
    %c0_i32_1 = arith.constant 0 : i32
    return %arg0, %c0_i32, %c0_i32_0 : i32, i32, i32
  }
  func.func @transform_3(%arg0: i32, %arg1: i32) -> (i32, i32, i32) {
    %c0_i32 = arith.constant 0 : i32
    %c0_i32_0 = arith.constant 0 : i32
    %c0_i32_1 = arith.constant 0 : i32
    %c0_i32_2 = arith.constant 0 : i32
    return %c0_i32, %c0_i32_0, %c0_i32_1 : i32, i32, i32
  }
  func.func @transform_4(%arg0: i32, %arg1: i32) -> (i32, i32, i32) {
    %c0_i32 = arith.constant 0 : i32
    %c0_i32_0 = arith.constant 0 : i32
    %c0_i32_1 = arith.constant 0 : i32
    %c0_i32_2 = arith.constant 0 : i32
    return %c0_i32, %c0_i32_0, %c0_i32_1 : i32, i32, i32
  }
  func.func @transform_5(%arg0: i32, %arg1: i32) -> (i32, i32, i32) {
    %c0_i32 = arith.constant 0 : i32
    %c0_i32_0 = arith.constant 0 : i32
    %c0_i32_1 = arith.constant 0 : i32
    %c0_i32_2 = arith.constant 0 : i32
    return %c0_i32, %c0_i32_0, %c0_i32_1 : i32, i32, i32
  }
  func.func @transform_6(%arg0: i32, %arg1: i32) -> (i32, i32, i32) {
    %c0_i32 = arith.constant 0 : i32
    %c0_i32_0 = arith.constant 0 : i32
    %c0_i32_1 = arith.constant 0 : i32
    %c0_i32_2 = arith.constant 0 : i32
    return %c0_i32, %c0_i32_0, %c0_i32_1 : i32, i32, i32
  }
  func.func @transform_7(%arg0: i32, %arg1: i32) -> (i32, i32) {
    %c0_i32 = arith.constant 0 : i32
    %c0_i32_0 = arith.constant 0 : i32
    %c0_i32_1 = arith.constant 0 : i32
    return %c0_i32, %c0_i32_0 : i32, i32
  }
  func.func @transform_8(%arg0: i32, %arg1: i32) -> (i32, i32) {
    %c0_i32 = arith.constant 0 : i32
    %c0_i32_0 = arith.constant 0 : i32
    %c0_i32_1 = arith.constant 0 : i32
    return %c0_i32, %c0_i32_0 : i32, i32
  }
  func.func @transform_9(%arg0: i32, %arg1: i32) -> (i32, i32, i32) {
    %c0_i32 = arith.constant 0 : i32
    %c0_i32_0 = arith.constant 0 : i32
    return %arg0, %arg1, %c0_i32 : i32, i32, i32
  }
  func.func @transform_10(%arg0: i32, %arg1: i32) -> (i32, i32, i32, i32) {
    %c0_i32 = arith.constant 0 : i32
    %c0_i32_0 = arith.constant 0 : i32
    %c0_i32_1 = arith.constant 0 : i32
    return %arg0, %c0_i32, %arg1, %c0_i32_0 : i32, i32, i32, i32
  }
}

</mosaic_0001>

<bundles_post_ra>
// kernel: tpu_custom_call.1
= control target key start
LH: loop header
LB: loop body
LE: loop exit
PB: predicated region body
PF: predicated region fallthrough
CT: control target
= control target key end

     0   :  { %s2932_s0 = inlined_call_operand.vmem [shape: f32[2,8,32], index: 0, kind: input, shape index: {}]   ;;  %s2933_s1 = inlined_call_operand.vmem [shape: f32[2,8,32], index: 1, kind: input, shape index: {}]   ;;  %s2934_s2 = inlined_call_operand.vmem [shape: f32[2,8,32], index: 2, kind: input, shape index: {}]   ;;  %s2935_s3 = inlined_call_operand.vmem [shape: bf16[4,32,8], index: 3, kind: input, shape index: {}]   ;;  %s2936_s4 = inlined_call_operand.vmem [shape: bf16[4,32,8], index: 4, kind: input, shape index: {}]   ;;  %s2937_s5 = inlined_call_operand.vmem [shape: bf16[4,32,8], index: 5, kind: input, shape index: {}]   ;;  %s2938_s6 = inlined_call_operand.vmem [shape: bf16[4,8,32], index: 6, kind: input, shape index: {}]   ;;  %s2939_s7 = inlined_call_operand.vmem [shape: f32[1,32], index: 7, kind: input, shape index: {}]   ;;  %s2940_s8 = inlined_call_operand.vmem [shape: f32[1,32], index: 8, kind: input, shape index: {}]   ;;  %s2941_s9 = inlined_call_operand.hbm [shape: f32[2,8,32], index: 9, kind: output, shape index: {0}]   ;;  %s2942_s10 = inlined_call_operand.hbm [shape: f32[2,4,8,8], index: 10, kind: output, shape index: {1}]  }
   0x1   :  { %2943 = sst [smem:[#allocation8_spill]] %s2932_s0 }
   0x2   :  { %16 = vsyncpa [#allocation3], 0 }
   0x3   :  { %18 = vsyncpa [#allocation3 + $0x1], 0 }
   0x4   :  { %19 = vsyncpa [#allocation5], 0 }
   0x5   :  { %21 = vsyncpa [#allocation5 + $0x1], 0  ;;  %s2523_s13 = smov 0   ;;  %s2525_s14 = smov 0  }
   0x6   :  { %s2527_s15 = smov 0   ;;  %s2529_s16 = smov 0  }
   0x7   :  { %s2531_s17 = smov 0   ;;  %s2533_s18 = smov 0  }
   0x8 LB: > { %s1948_s19 = sadd.s32 4294967295, %s2460_s18   ;;  %s1949_s20 = sadd.s32 4294967294, %s2460_s18   ;;  %s2460_s18 = sphi %s2533_s18, %s27_s18   ;;  %s2456_s17 = sphi %s2531_s17, %s2952_s17   ;;  %s2452_s16 = sphi %s2529_s16, %s2951_s16   ;;  %s2448_s15 = sphi %s2527_s15, %s2950_s15   ;;  %s2444_s14 = sphi %s2525_s14, %s2949_s14   ;;  %s2440_s13 = sphi %s2523_s13, %s2948_s13  }
   0x9   : > { %s39_s21 = sadd.s32 1, %s2456_s17  ;;  %s254_s22 = sadd.s32 1, %s2448_s15 }
   0xa   : > { %p41_p0 = scmp.ge.s32.totalorder %s39_s21, 2  ;;  %p264_p1 = scmp.ne.s32.totalorder %s2448_s15, %s2444_s14 }
   0xb   : > { %p265_p2 = scmp.eq.s32.totalorder %s1948_s19, 1  ;;  %p270_p3 = scmp.ne.s32.totalorder %s2444_s14, %s2440_s13 }
   0xc   : > { %s2954_s21 = smov (%p41_p0, %s39_s21), 0  ;;  %p271_p5 = scmp.eq.s32.totalorder %s1949_s20, 1 }
   0xd   : > { %p2563_p4 = por %p265_p2, %p264_p1  ;;  %s249_s24 = ssub.s32 %s2456_s17, %s2954_s21 }
   0xe   : > { %p1952_p6 = scmp.ge.s32.totalorder %s2460_s18, 1  ;;  %p252_p7 = scmp.eq.s32.totalorder %s249_s24, 0 }
   0xf   : > { %p2570_p8 = por %p271_p5, %p270_p3  ;;  %p359_p9 = scmp.lt.s32.totalorder %s2460_s18, 3 }
  0x10   : > { %s2576_s26 = scalar_select %p252_p7, %s2448_s15, %s254_s22  }
  0x11   : > { %p360_p10 = pnand %p1952_p6, %p359_p9 }
  0x12   : > { %p412_p11 = scmp.lt.s32.totalorder (!%p360_p10), %s2452_s16, 1  ;;  %vm431_vm0 = vcmask (!%p360_p10), 261120   ;;  %s2946_s0 = sld [smem:[#allocation8_spill]] (!%p360_p10)  ;;  %v2308_v7 = vld [vmem:[%s2935_s3] sm:$0xff] (!%p360_p10)   ;;  %v2309_v8 = vld [vmem:[%s2935_s3 + $0x10] sm:$0xff] (!%p360_p10)   ;;  %v2462_v9 = vmov (!%p360_p10), 0.0  }
  0x13   : > { %363 = sbr.rel (%p360_p10) target bundleno = 1571 (0x623), region = 56  ;;  %2076 = vmatprep.subr.bf16.mxu0 (!%p360_p10), %v2462_v9  ;;  %2084 = vmatprep.subr.bf16.mxu1 (!%p360_p10), %v2462_v9  ;;  %v2310_v10 = vld [vmem:[%s2935_s3 + $0x8] sm:$0xff] (!%p360_p10)   ;;  %v2311_v11 = vld [vmem:[%s2935_s3 + $0x18] sm:$0xff] (!%p360_p10)   ;;  %vm2463_vm1 = vmmov (!%p360_p10), 0   ;;  %v1958_v16 = vld [vmem:[%s2939_s7] ss:$0 sm:$0xff] (!%p360_p10) }
  0x14   : > { %2077 = vmatpush3.bf16.msra.mxu0 (!%p360_p10), %v2308_v7  ;;  %2085 = vmatpush3.bf16.msra.mxu1 (!%p360_p10), %v2309_v8  ;;  %v1959_v18 = vld [vmem:[%s2940_s8] ss:$0 sm:$0xff] (!%p360_p10)  ;;  %v2313_v23 = vld [vmem:[%s2935_s3 + $0x30] sm:$0xff] (!%p360_p10)   ;;  %v2314_v25 = vld [vmem:[%s2935_s3 + $0x28] sm:$0xff] (!%p360_p10)   ;;  %vm1155_vm2 = vcmask (!%p360_p10), 64512   ;;  %vm1399_vm3 = vcmask (!%p360_p10), 1043456  }
  0x15   : > { %2078 = vmatprep.subr.bf16.mxu0 (!%p360_p10), %v2462_v9  ;;  %2086 = vmatprep.subr.bf16.mxu1 (!%p360_p10), %v2462_v9  ;;  %v2312_v22 = vld [vmem:[%s2935_s3 + $0x20] sm:$0xff] (!%p360_p10)   ;;  %v2315_v26 = vld [vmem:[%s2935_s3 + $0x38] sm:$0xff] (!%p360_p10)   ;;  %v2317_v28 = vld [vmem:[%s2936_s4 + $0x10] sm:$0xff] (!%p360_p10)   ;;  %s2781_s22 = sand.u32 (!%p360_p10), 1, %s2444_s14   ;;  %s2015_s30 = sshll.u32 (!%p360_p10), %s2452_s16, 9 }
  0x16   : > { %2080 = vmatprep.mubr.msk.bf16.mxu0 (!%p360_p10), %vm2463_vm1, %v2462_v9  ;;  %2088 = vmatprep.mubr.msk.bf16.mxu1 (!%p360_p10), %vm2463_vm1, %v2462_v9  ;;  %v2316_v27 = vld [vmem:[%s2936_s4] sm:$0xff] (!%p360_p10)   ;;  %v2318_v30 = vld [vmem:[%s2936_s4 + $0x8] sm:$0xff] (!%p360_p10)   ;;  %v2319_v31 = vld [vmem:[%s2936_s4 + $0x18] sm:$0xff] (!%p360_p10)   ;;  %s1954_s24 = sshll.u32 (!%p360_p10), %s2781_s22, 5 }
  0x17   : > { %v2320_v33 = vld [vmem:[%s2936_s4 + $0x20] sm:$0xff] (!%p360_p10)   ;;  %v2321_v34 = vld [vmem:[%s2936_s4 + $0x30] sm:$0xff] (!%p360_p10)   ;;  %v2322_v35 = vld [vmem:[%s2936_s4 + $0x28] sm:$0xff] (!%p360_p10)  }
  0x18   : > { %2079 = vmatpush3.bf16.msra.mxu0 (!%p360_p10), %v2310_v10  ;;  %2087 = vmatpush3.bf16.msra.mxu1 (!%p360_p10), %v2311_v11  ;;  %v2323_v36 = vld [vmem:[%s2936_s4 + $0x38] sm:$0xff] (!%p360_p10)   ;;  %v2324_v37 = vld [vmem:[%s2937_s5] sm:$0xff] (!%p360_p10)   ;;  %v2325_v38 = vld [vmem:[%s2937_s5 + $0x10] sm:$0xff] (!%p360_p10)  }
  0x19   : > { %2092 = vmatprep.subr.bf16.mxu0 (!%p360_p10), %v2462_v9  ;;  %2100 = vmatprep.subr.bf16.mxu1 (!%p360_p10), %v2462_v9  ;;  %v2326_v40 = vld [vmem:[%s2937_s5 + $0x8] sm:$0xff] (!%p360_p10)   ;;  %v2327_v42 = vld [vmem:[%s2937_s5 + $0x18] sm:$0xff] (!%p360_p10)   ;;  %v2328_v43 = vld [vmem:[%s2937_s5 + $0x20] sm:$0xff] (!%p360_p10)  }
  0x1a   : > { %s413_s27 = scalar_select %p412_p11, %s2452_s16, 1  ;;  %v2329_v44 = vld [vmem:[%s2937_s5 + $0x30] sm:$0xff]   ;;  %v2330_v45 = vld [vmem:[%s2937_s5 + $0x28] sm:$0xff]   ;;  %v2331_v46 = vld [vmem:[%s2937_s5 + $0x38] sm:$0xff]  }
  0x1c   : > { %s2580_s28 = sshll.u32 %s413_s27, 3  ;;  %s2786_s27 = scalar_lea.vmem [#allocation4], %s1954_s24 }
  0x1d   : > { %s418_s11 = scalar_lea.vmem %s2946_s0, %s2580_s28  ;;  %s426_s12 = scalar_lea.vmem %s2934_s2, %s2580_s28 }
  0x1e   : > { %v2586_v0 = vld [vmem:[%s418_s11] sm:$0xff]  ;;  %s422_s11 = scalar_lea.vmem %s2933_s1, %s2580_s28  ;;  %s1816_s29 = sshll.u32 %s2786_s27, 4  ;;  %s2842_s29 = int_to_ptr.vmem [resolvable:$true] %s1816_s29 }
  0x1f   : > { %v432_v1 = vsel %vm431_vm0, %v2586_v0, 0.0  ;;  %v429_v29 = vld [vmem:[%s422_s11] sm:$0xff]  ;;  %s2350_s20 = scalar_lea.vmem %s2842_s29, 512  ;;  %s2464_s24 = smov [#allocation4]  }
  0x20   : > { %433 = vadd.xlane.f32.xlu0 %v432_v1  ;;  %v464_v32 = vpack.c.bf16 %v429_v29, %v429_v29  ;;  %v430_v39 = vld [vmem:[%s426_s12] sm:$0xff]  ;;  %s2847_s12 = scalar_lea.hbm %s2942_s10, %s2015_s30  ;;  %p2351_p12 = scmp.ne.s32.totalorder %s2842_s29, %s2350_s20 }
  0x21   : > { %v465_v41 = vpack.c.bf16 %v430_v39, %v430_v39  ;;  %s2354_s0 = sshll.u32 %s2464_s24, 4  ;;  %s2355_s0 = int_to_ptr.vmem [resolvable:$false] %s2354_s0 }
  0x22   : > { %p2352_p13 = pnand %p2351_p12, %p2563_p4  ;;  %p2357_p1 = scmp.lt.s32.totalorder %s2842_s29, %s2355_s0 }
  0x24   : > { %p2353_p0 = pneg %p2352_p13 }
  0xad   : > { %v434_v2 = vpop.xlane.xlu0 %433 }
  0xae   : > { %v436_v3 = vmul.f32 0.03125, %v434_v2 }
  0xb0   : > { %v437_v4 = vsub.f32 %v2586_v0, %v436_v3 }
  0xb2   : > { %v438_v5 = vmul.f32 %v437_v4, %v437_v4 }
  0xb4   : > { %v439_v6 = vsel %vm431_vm0, %v438_v5, 0.0 }
  0xb5   : > { %440 = vadd.xlane.f32.xlu0 %v439_v6 }
 0x142   : > { %v441_v12 = vpop.xlane.xlu0 %440 }
 0x143   : > { %v442_v13 = vmul.f32 0.03125, %v441_v12 }
 0x145   : > { %v443_v14 = vadd.f32 1e-06, %v442_v13 }
 0x147   : > { %2332 = vrsqrt.f32 %v443_v14 }
 0x151   : > { %v2333_v15 = vpop.eup %2332 }
 0x152   : > { %v445_v17 = vmul.f32 %v2333_v15, %v437_v4 }
 0x154   : > { %v453_v19 = vmul.f32 %v1958_v16, %v445_v17 }
 0x156   : > { %v461_v20 = vadd.f32 %v1959_v18, %v453_v19 }
 0x158   : > { %v462_v21 = vmul.f32 0.35355338, %v461_v20 }
 0x15a   : > { %v463_v24 = vpack.c.bf16 %v462_v21, %v462_v21 }
 0x15c   : > { %2081 = vmatmul.mubr.msk.bf16.vlgmr.msra.gmra.mrb[0].mxu0 %vm431_vm0, %v463_v24  ;;  %2089 = vmatmul.mubr.msk.bf16.vlgmr.msra.gmra.mrb[0].mxu1 %vm431_vm0, %v463_v24 }
 0x15d   : > { %2093 = vmatpush3.bf16.msra.mxu0 %v2312_v22  ;;  %2101 = vmatpush3.bf16.msra.mxu1 %v2313_v23 }
 0x15e   : > { %2094 = vmatprep.subr.bf16.mxu0 %v2462_v9  ;;  %2102 = vmatprep.subr.bf16.mxu1 %v2462_v9 }
 0x15f   : > { %2096 = vmatprep.mubr.msk.bf16.mxu0 %vm2463_vm1, %v2462_v9  ;;  %2104 = vmatprep.mubr.msk.bf16.mxu1 %vm2463_vm1, %v2462_v9 }
 0x161   : > { %2095 = vmatpush3.bf16.msra.mxu0 %v2314_v25  ;;  %2103 = vmatpush3.bf16.msra.mxu1 %v2315_v26 }
 0x162   : > { %2108 = vmatprep.subr.bf16.mxu0 %v2462_v9  ;;  %2116 = vmatprep.subr.bf16.mxu1 %v2462_v9 }
 0x164   : > { %2097 = vmatmul.mubr.msk.bf16.vlgmr.msra.gmra.mrb[4].mxu0 %vm431_vm0, %v463_v24  ;;  %2105 = vmatmul.mubr.msk.bf16.vlgmr.msra.gmra.mrb[4].mxu1 %vm431_vm0, %v463_v24 }
 0x165   : > { %2109 = vmatpush3.bf16.msra.mxu0 %v2316_v27  ;;  %2117 = vmatpush3.bf16.msra.mxu1 %v2317_v28 }
 0x166   : > { %2110 = vmatprep.subr.bf16.mxu0 %v2462_v9  ;;  %2118 = vmatprep.subr.bf16.mxu1 %v2462_v9 }
 0x167   : > { %2112 = vmatprep.mubr.msk.bf16.mxu0 %vm2463_vm1, %v2462_v9  ;;  %2120 = vmatprep.mubr.msk.bf16.mxu1 %vm2463_vm1, %v2462_v9 }
 0x169   : > { %2111 = vmatpush3.bf16.msra.mxu0 %v2318_v30  ;;  %2119 = vmatpush3.bf16.msra.mxu1 %v2319_v31 }
 0x16a   : > { %2124 = vmatprep.subr.bf16.mxu0 %v2462_v9  ;;  %2132 = vmatprep.subr.bf16.mxu1 %v2462_v9 }
 0x16c   : > { %2113 = vmatmul.mubr.msk.bf16.vlgmr.msra.gmra.mrb[8].mxu0 %vm431_vm0, %v464_v32  ;;  %2121 = vmatmul.mubr.msk.bf16.vlgmr.msra.gmra.mrb[8].mxu1 %vm431_vm0, %v464_v32 }
 0x16d   : > { %2125 = vmatpush3.bf16.msra.mxu0 %v2320_v33  ;;  %2133 = vmatpush3.bf16.msra.mxu1 %v2321_v34 }
 0x16e   : > { %2126 = vmatprep.subr.bf16.mxu0 %v2462_v9  ;;  %2134 = vmatprep.subr.bf16.mxu1 %v2462_v9 }
 0x16f   : > { %2128 = vmatprep.mubr.msk.bf16.mxu0 %vm2463_vm1, %v2462_v9  ;;  %2136 = vmatprep.mubr.msk.bf16.mxu1 %vm2463_vm1, %v2462_v9 }
 0x171   : > { %2127 = vmatpush3.bf16.msra.mxu0 %v2322_v35  ;;  %2135 = vmatpush3.bf16.msra.mxu1 %v2323_v36 }
 0x172   : > { %2140 = vmatprep.subr.bf16.mxu0 %v2462_v9  ;;  %2148 = vmatprep.subr.bf16.mxu1 %v2462_v9 }
 0x174   : > { %2129 = vmatmul.mubr.msk.bf16.vlgmr.msra.gmra.mrb[12].mxu0 %vm431_vm0, %v464_v32  ;;  %2137 = vmatmul.mubr.msk.bf16.vlgmr.msra.gmra.mrb[12].mxu1 %vm431_vm0, %v464_v32 }
 0x175   : > { %2141 = vmatpush3.bf16.msra.mxu0 %v2324_v37  ;;  %2149 = vmatpush3.bf16.msra.mxu1 %v2325_v38 }
 0x176   : > { %2142 = vmatprep.subr.bf16.mxu0 %v2462_v9  ;;  %2150 = vmatprep.subr.bf16.mxu1 %v2462_v9 }
 0x177   : > { %2144 = vmatprep.mubr.msk.bf16.mxu0 %vm2463_vm1, %v2462_v9  ;;  %2152 = vmatprep.mubr.msk.bf16.mxu1 %vm2463_vm1, %v2462_v9 }
 0x179   : > { %2143 = vmatpush3.bf16.msra.mxu0 %v2326_v40  ;;  %2151 = vmatpush3.bf16.msra.mxu1 %v2327_v42 }
 0x17a   : > { %2156 = vmatprep.subr.bf16.mxu0 %v2462_v9  ;;  %2164 = vmatprep.subr.bf16.mxu1 %v2462_v9 }
 0x17c   : > { %2145 = vmatmul.mubr.msk.bf16.vlgmr.msra.gmra.mrb[16].mxu0 %vm431_vm0, %v465_v41  ;;  %2153 = vmatmul.mubr.msk.bf16.vlgmr.msra.gmra.mrb[16].mxu1 %vm431_vm0, %v465_v41 }
 0x17d   : > { %2157 = vmatpush3.bf16.msra.mxu0 %v2328_v43  ;;  %2160 = vmatprep.mubr.msk.bf16.mxu0 %vm2463_vm1, %v2462_v9 }
 0x17e   : > { %2158 = vmatprep.subr.bf16.mxu0 %v2462_v9  ;;  %2165 = vmatpush3.bf16.msra.mxu1 %v2329_v44 }
 0x17f   : > { %2168 = vmatprep.mubr.msk.bf16.mxu1 %vm2463_vm1, %v2462_v9  ;;  %2166 = vmatprep.subr.bf16.mxu1 %v2462_v9 }
 0x181   : > { %2159 = vmatpush3.bf16.msra.mxu0 %v2330_v45 }
 0x182   : > { %2167 = vmatpush3.bf16.msra.mxu1 %v2331_v46  ;;  %2172 = vmatprep.subr.bf16.mxu0 %v2462_v9 }
 0x183   : > { %2178 = vmatprep.subr.bf16.mxu1 %v2462_v9 }
 0x184   : > { %2161 = vmatmul.mubr.msk.bf16.vlgmr.msra.gmra.mrb[20].mxu0 %vm431_vm0, %v465_v41 }
 0x185   : > { %2169 = vmatmul.mubr.msk.bf16.vlgmr.msra.gmra.mrb[20].mxu1 %vm431_vm0, %v465_v41  ;;  %2174 = vmatprep.mubr.msk.bf16.mxu0 %vm2463_vm1, %v2462_v9 }
 0x186   : > { %2180 = vmatprep.mubr.msk.bf16.mxu1 %vm2463_vm1, %v2462_v9 }
 0x22f   : > { %v531_v47 = vpop.f32.mrb[0].mxu0  ;;  %v583_v48 = vpop.f32.mrb[0].mxu1 }
 0x230   : > { %v2082_v49 = vpop.f32.mrb[1].mxu0  ;;  %v2090_v50 = vpop.f32.mrb[1].mxu1  ;;  %v1147_v15 = vpack.c.bf16 %v531_v47, %v531_v47  ;;  %v1148_v16 = vpack.c.bf16 %v583_v48, %v583_v48 }
 0x231   : > { %v534_v51 = vpop.f32.mrb[2].mxu0  ;;  %v586_v52 = vpop.f32.mrb[2].mxu1 }
 0x232   : > { %v2083_v53 = vpop.f32.mrb[3].mxu0  ;;  %v2091_v54 = vpop.f32.mrb[3].mxu1 }
 0x237   : > { %v635_v55 = vpop.f32.mrb[4].mxu0  ;;  %v687_v56 = vpop.f32.mrb[4].mxu1 }
 0x238   : > { %v2098_v57 = vpop.f32.mrb[5].mxu0  ;;  %v2106_v58 = vpop.f32.mrb[5].mxu1  ;;  %v1149_v27 = vpack.c.bf16 %v635_v55, %v635_v55  ;;  %v1150_v28 = vpack.c.bf16 %v687_v56, %v687_v56 }
 0x239   : > { %v638_v59 = vpop.f32.mrb[6].mxu0  ;;  %v690_v60 = vpop.f32.mrb[6].mxu1 }
 0x23a   : > { %v2099_v61 = vpop.f32.mrb[7].mxu0  ;;  %v2107_v62 = vpop.f32.mrb[7].mxu1 }
 0x23f   : > { %v758_v63 = vpop.f32.mrb[8].mxu0  ;;  %v810_v1 = vpop.f32.mrb[8].mxu1 }
 0x240   : > { %v1151_v2 = vpack.c.bf16 %v758_v63, %v758_v63  ;;  %v1152_v3 = vpack.c.bf16 %v810_v1, %v810_v1  ;;  %v2114_v4 = vpop.f32.mrb[9].mxu0  ;;  %v2122_v5 = vpop.f32.mrb[9].mxu1 }
 0x241   : > { %v761_v6 = vpop.f32.mrb[10].mxu0  ;;  %v813_v7 = vpop.f32.mrb[10].mxu1 }
 0x242   : > { %v1160_v8 = vsel %vm1155_vm2, %v1151_v2, 0  ;;  %v1206_v10 = vsel %vm1155_vm2, %v1152_v3, 0  ;;  %v2115_v11 = vpop.f32.mrb[11].mxu0  ;;  %v2123_v12 = vpop.f32.mrb[11].mxu1 }
 0x243   : > { %2173 = vmatpush3.bf16.xpose.msra.mxu0 %v1160_v8  ;;  %2179 = vmatpush3.bf16.xpose.msra.mxu1 %v1206_v10 }
 0x244   : > { %2184 = vmatprep.subr.bf16.mxu0 %v2462_v9  ;;  %2190 = vmatprep.subr.bf16.mxu1 %v2462_v9 }
 0x247   : > { %v862_v13 = vpop.f32.mrb[12].mxu0  ;;  %v914_v14 = vpop.f32.mrb[12].mxu1 }
 0x248   : > { %v1153_v17 = vpack.c.bf16 %v862_v13, %v862_v13  ;;  %v1154_v18 = vpack.c.bf16 %v914_v14, %v914_v14  ;;  %v2130_v19 = vpop.f32.mrb[13].mxu0  ;;  %v2138_v20 = vpop.f32.mrb[13].mxu1 }
 0x249   : > { %v865_v21 = vpop.f32.mrb[14].mxu0  ;;  %v917_v22 = vpop.f32.mrb[14].mxu1 }
 0x24a   : > { %v1252_v23 = vsel %vm1155_vm2, %v1153_v17, 0  ;;  %v1298_v24 = vsel %vm1155_vm2, %v1154_v18, 0  ;;  %v2131_v25 = vpop.f32.mrb[15].mxu0  ;;  %2175 = vmatmul.mubr.msk.bf16.vlgmr.msra.gmra.mrb[24].mxu0 %vm1155_vm2, %v1147_v15  ;;  %2181 = vmatmul.mubr.msk.bf16.vlgmr.msra.gmra.mrb[24].mxu1 %vm1155_vm2, %v1148_v16  ;;  %v2139_v26 = vpop.f32.mrb[15].mxu1 }
 0x24b   : > { %2185 = vmatpush3.bf16.xpose.msra.mxu0 %v1252_v23  ;;  %2191 = vmatpush3.bf16.xpose.msra.mxu1 %v1298_v24 }
 0x24c   : > { %2186 = vmatprep.mubr.msk.bf16.mxu0 %vm2463_vm1, %v2462_v9  ;;  %2192 = vmatprep.mubr.msk.bf16.mxu1 %vm2463_vm1, %v2462_v9 }
 0x24d   : > { %2196 = vmatprep.subr.bf16.mxu0 %v2462_v9  ;;  %2202 = vmatprep.subr.bf16.mxu1 %v2462_v9 }
 0x24f   : > { %v985_v29 = vpop.f32.mrb[16].mxu0  ;;  %v1037_v33 = vpop.f32.mrb[16].mxu1 }
 0x250   : > { %v1392_v30 = vpack.c.bf16 %v985_v29, %v985_v29  ;;  %v2146_v31 = vpop.f32.mrb[17].mxu0  ;;  %v1393_v36 = vpack.c.bf16 %v1037_v33, %v1037_v33  ;;  %v2154_v37 = vpop.f32.mrb[17].mxu1 }
 0x251   : > { %v988_v32 = vpop.f32.mrb[18].mxu0  ;;  %v1040_v38 = vpop.f32.mrb[18].mxu1 }
 0x252   : > { %2187 = vmatmul.mubr.msk.bf16.vlgmr.msra.gmra.mrb[28].mxu0 %vm1155_vm2, %v1149_v27  ;;  %2193 = vmatmul.mubr.msk.bf16.vlgmr.msra.gmra.mrb[28].mxu1 %vm1155_vm2, %v1150_v28  ;;  %v1401_v34 = vsel %vm1399_vm3, %v1392_v30, 0  ;;  %v2147_v35 = vpop.f32.mrb[19].mxu0  ;;  %v1447_v39 = vsel %vm1399_vm3, %v1393_v36, 0  ;;  %v2155_v40 = vpop.f32.mrb[19].mxu1 }
 0x253   : > { %2198 = vmatprep.mubr.msk.bf16.mxu0 %vm2463_vm1, %v2462_v9  ;;  %2204 = vmatprep.mubr.msk.bf16.mxu1 %vm2463_vm1, %v2462_v9 }
 0x254   : > { %2197 = vmatpush3.bf16.msra.mxu0 %v1401_v34  ;;  %2203 = vmatpush3.bf16.msra.mxu1 %v1447_v39 }
 0x255   : > { %2208 = vmatprep.subr.bf16.mxu0 %v2462_v9  ;;  %2214 = vmatprep.subr.bf16.mxu1 %v2462_v9 }
 0x257   : > { %v2768_v41 = vpop.f32.mrb[20].mxu0 }
 0x258   : > { %v2770_v42 = vpop.f32.mrb[20].mxu1  ;;  %v2162_v43 = vpop.f32.mrb[21].mxu0  ;;  %v1394_v32 = vpack.c.bf16 %v2768_v41, %v2768_v41 }
 0x259   : > { %v2170_v44 = vpop.f32.mrb[21].mxu1  ;;  %v1092_v45 = vpop.f32.mrb[22].mxu0  ;;  %v1395_v37 = vpack.c.bf16 %v2770_v42, %v2770_v42  ;;  %v1585_v42 = vld [vmem:[%s2938_s6] sm:$0xf] }
 0x25a   : > { %v1144_v46 = vpop.f32.mrb[22].mxu1  ;;  %v2163_v47 = vpop.f32.mrb[23].mxu0  ;;  %v1493_v36 = vsel %vm1399_vm3, %v1394_v32, 0 }
 0x25b   : > { %v2171_v48 = vpop.f32.mrb[23].mxu1  ;;  %v1539_v43 = vsel %vm1399_vm3, %v1395_v37, 0  ;;  %v1593_v47 = vsel %vm1399_vm3, %v1585_v42, 0 }
 0x31d   : > { %v1196_v49 = vpop.f32.mrb[24].mxu0  ;;  %v1242_v50 = vpop.f32.mrb[24].mxu1 }
 0x31e   : > { %v2176_v51 = vpop.f32.mrb[25].mxu0  ;;  %v2182_v52 = vpop.f32.mrb[25].mxu1  ;;  %v1340_v53 = vsel %vm1155_vm2, %v1196_v49, -inf  ;;  %v1343_v58 = vsel %vm1155_vm2, %v1242_v50, -inf }
 0x31f   : > { %v1245_v54 = vpop.f32.mrb[26].mxu1  ;;  %1341 = vmax.xlane.f32.xlu1 %v1340_v53  ;;  %v1199_v55 = vpop.f32.mrb[26].mxu0  ;;  %v1587_v51 = vld [vmem:[%s2938_s6 + $0x8] sm:$0xf] }
 0x320   : > { %v2177_v56 = vpop.f32.mrb[27].mxu0  ;;  %v2183_v57 = vpop.f32.mrb[27].mxu1  ;;  %v1685_v55 = vsel %vm1399_vm3, %v1587_v51, 0 }
 0x321   : > { %v1588_v57 = vld [vmem:[%s2938_s6 + $0xc] sm:$0xf] }
 0x323   : > { %1344 = vmax.xlane.f32.xlu1 %v1343_v58 }
 0x325   : > { %v1288_v59 = vpop.f32.mrb[28].mxu0  ;;  %v1334_v60 = vpop.f32.mrb[28].mxu1 }
 0x326   : > { %v2188_v61 = vpop.f32.mrb[29].mxu0  ;;  %v2194_v62 = vpop.f32.mrb[29].mxu1  ;;  %v1349_v63 = vsel %vm1155_vm2, %v1334_v60, -inf  ;;  %v1346_v1 = vsel %vm1155_vm2, %v1288_v59, -inf }
 0x327   : > { %v1337_v2 = vpop.f32.mrb[30].mxu1  ;;  %1350 = vmax.xlane.f32.xlu1 %v1349_v63  ;;  %1347 = vmax.xlane.f32.xlu0 %v1346_v1  ;;  %v1291_v3 = vpop.f32.mrb[30].mxu0  ;;  %v1731_v62 = vsel %vm1399_vm3, %v1588_v57, 0 }
 0x328   : > { %v2189_v4 = vpop.f32.mrb[31].mxu0  ;;  %v2195_v5 = vpop.f32.mrb[31].mxu1 }
 0x3ac   : > { %v1342_v6 = vpop.xlane.xlu1 %1341 }
 0x3ad   : > { %v1352_v7 = vsub.f32 %v1196_v49, %v1342_v6  ;;  %v1586_v49 = vld [vmem:[%s2938_s6 + $0x4] sm:$0xf] }
 0x3af   : > { %v1356_v8 = vmul.f32 1.442695, %v1352_v7 }
 0x3b0   : > { %v1345_v10 = vpop.xlane.xlu1 %1344 }
 0x3b1   : > { %2334 = vpow2.f32 %v1356_v8  ;;  %v1353_v11 = vsub.f32 %v1242_v50, %v1345_v10  ;;  %v1639_v50 = vsel %vm1399_vm3, %v1586_v49, 0 }
 0x3b3   : > { %v1358_v12 = vmul.f32 1.442695, %v1353_v11 }
 0x3b4   : > { %v1351_v13 = vpop.xlane.xlu1 %1350  ;;  %v1348_v14 = vpop.xlane.xlu0 %1347 }
 0x3b5   : > { %2336 = vpow2.f32 %v1358_v12  ;;  %v1355_v15 = vsub.f32 %v1334_v60, %v1351_v13  ;;  %v1354_v16 = vsub.f32 %v1288_v59, %v1348_v14 }
 0x3b7   : > { %v1362_v17 = vmul.f32 1.442695, %v1355_v15  ;;  %v1360_v18 = vmul.f32 1.442695, %v1354_v16 }
 0x3b9   : > { %2338 = vpow2.f32 %v1362_v17 }
 0x3ba   : > { %2340 = vpow2.f32 %v1360_v18 }
 0x3bb   : > { %v2335_v19 = vpop.eup %2334 }
 0x3bc   : > { %v1364_v20 = vsel %vm1155_vm2, %v2335_v19, 0.0 }
 0x3bd   : > { %1365 = vadd.xlane.f32.xlu0 %v1364_v20 }
 0x3bf   : > { %v2337_v21 = vpop.eup %2336 }
 0x3c0   : > { %v1367_v22 = vsel %vm1155_vm2, %v2337_v21, 0.0 }
 0x3c1   : > { %1368 = vadd.xlane.f32.xlu1 %v1367_v22 }
 0x3c3   : > { %v2339_v23 = vpop.eup %2338 }
 0x3c4   : > { %v2341_v24 = vpop.eup %2340  ;;  %v1373_v25 = vsel %vm1155_vm2, %v2339_v23, 0.0 }
 0x3c5   : > { %1374 = vadd.xlane.f32.xlu1 %v1373_v25  ;;  %v1370_v26 = vsel %vm1155_vm2, %v2341_v24, 0.0 }
 0x3c6   : > { %1371 = vadd.xlane.f32.xlu0 %v1370_v26 }
 0x44a   : > { %v1366_v27 = vpop.xlane.xlu0 %1365 }
 0x44b   : > { %2342 = vrcp.f32 %v1366_v27 }
 0x44e   : > { %v1369_v28 = vpop.xlane.xlu1 %1368 }
 0x44f   : > { %2344 = vrcp.f32 %v1369_v28 }
 0x452   : > { %v1375_v29 = vpop.xlane.xlu1 %1374 }
 0x453   : > { %2346 = vrcp.f32 %v1375_v29  ;;  %v1372_v30 = vpop.xlane.xlu0 %1371 }
 0x454   : > { %2348 = vrcp.f32 %v1372_v30 }
 0x455   : > { %v2343_v31 = vpop.eup %2342 }
 0x456   : > { %v1380_v33 = vmul.f32 %v2343_v31, %v2335_v19 }
 0x458   : > { %v1388_v34 = vpack.c.bf16 %v1380_v33, %v1380_v33  ;;  %1384 = vst.msk [vmem:[%s2786_s27] sm:$0xff] %vm1155_vm2, %v1380_v33 }
 0x459   : > { %v2345_v35 = vpop.eup %2344 }
 0x45a   : > { %v1381_v38 = vmul.f32 %v2345_v35, %v2337_v21  ;;  %2199 = vmatmul.mubr.msk.bf16.vlgmr.msra.gmra.mrb[32].mxu0 %vm1155_vm2, %v1388_v34 }
 0x45b   : > { %2209 = vmatpush3.bf16.msra.mxu0 %v1493_v36  ;;  %2210 = vmatprep.mubr.msk.bf16.mxu0 %vm2463_vm1, %v2462_v9 }
 0x45c   : > { %v1389_v39 = vpack.c.bf16 %v1381_v38, %v1381_v38  ;;  %2220 = vmatprep.subr.bf16.mxu0 %v2462_v9  ;;  %1385 = vst.msk [vmem:[%s2786_s27 + $0x8] sm:$0xff] %vm1155_vm2, %v1381_v38 }
 0x45d   : > { %v2347_v40 = vpop.eup %2346 }
 0x45e   : > { %v2349_v41 = vpop.eup %2348  ;;  %v1383_v44 = vmul.f32 %v2347_v40, %v2339_v23  ;;  %2205 = vmatmul.mubr.msk.bf16.vlgmr.msra.gmra.mrb[32].mxu1 %vm1155_vm2, %v1389_v39 }
 0x45f   : > { %v1382_v45 = vmul.f32 %v2349_v41, %v2341_v24  ;;  %2215 = vmatpush3.bf16.msra.mxu1 %v1539_v43  ;;  %2216 = vmatprep.mubr.msk.bf16.mxu1 %vm2463_vm1, %v2462_v9 }
 0x460   : > { %2226 = vmatprep.subr.bf16.mxu1 %v2462_v9  ;;  %1387 = vst.msk [vmem:[%s2786_s27 + $0x18] sm:$0xff] %vm1155_vm2, %v1383_v44  ;;  %v1391_v48 = vpack.c.bf16 %v1383_v44, %v1383_v44 }
 0x461   : > { %v1390_v46 = vpack.c.bf16 %v1382_v45, %v1382_v45  ;;  %1386 = vst.msk [vmem:[%s2786_s27 + $0x10] sm:$0xff] %vm1155_vm2, %v1382_v45  ;;  %s2356_s27 = scalar_lea.vmem %s2355_s0, 1024 }
 0x462   : > { %p2358_p2 = scmp.lt.s32.totalorder %s2356_s27, %s2350_s20 }
 0x463   : > { %2211 = vmatmul.mubr.msk.bf16.vlgmr.msra.gmra.mrb[36].mxu0 %vm1155_vm2, %v1390_v46 }
 0x464   : > { %2221 = vmatpush3.bf16.msra.mxu0 %v1593_v47  ;;  %2222 = vmatprep.mubr.msk.bf16.mxu0 %vm2463_vm1, %v2462_v9  ;;  %p2359_p3 = por %p2358_p2, %p2357_p1 }
 0x465   : > { %2232 = vmatprep.subr.bf16.mxu0 %v2462_v9 }
 0x466   : > { %2217 = vmatmul.mubr.msk.bf16.vlgmr.msra.gmra.mrb[36].mxu1 %vm1155_vm2, %v1391_v48  ;;  %p2360_p5 = pnand %p2359_p3, %p2353_p0 }
 0x467   : > { %2228 = vmatprep.mubr.msk.bf16.mxu1 %vm2463_vm1, %v2462_v9  ;;  %2227 = vmatpush3.bf16.msra.mxu1 %v1639_v50 }
 0x468   : > { %2238 = vmatprep.subr.bf16.mxu1 %v2462_v9 }
 0x52d   : > { %v1437_v52 = vpop.f32.mrb[32].mxu0 }
 0x52e   : > { %v1581_v53 = vpack.c.bf16 %v1437_v52, %v1437_v52  ;;  %v2200_v54 = vpop.f32.mrb[33].mxu0 }
 0x52f   : > { %v1440_v56 = vpop.f32.mrb[34].mxu0 }
 0x530   : > { %v2201_v58 = vpop.f32.mrb[35].mxu0  ;;  %2223 = vmatmul.mubr.msk.bf16.vlgmr.msra.gmra.mrb[40].mxu0 %vm1155_vm2, %v1581_v53 }
 0x531   : > { %v1483_v59 = vpop.f32.mrb[32].mxu1  ;;  %2233 = vmatpush3.bf16.msra.mxu0 %v1685_v55  ;;  %2234 = vmatprep.mubr.msk.bf16.mxu0 %vm2463_vm1, %v2462_v9 }
 0x532   : > { %v1582_v60 = vpack.c.bf16 %v1483_v59, %v1483_v59  ;;  %v2206_v61 = vpop.f32.mrb[33].mxu1 }
 0x533   : > { %v1486_v63 = vpop.f32.mrb[34].mxu1 }
 0x534   : > { %v2207_v1 = vpop.f32.mrb[35].mxu1  ;;  %2229 = vmatmul.mubr.msk.bf16.vlgmr.msra.gmra.mrb[40].mxu1 %vm1155_vm2, %v1582_v60 }
 0x535   : > { %2239 = vmatpush3.bf16.msra.mxu1 %v1731_v62  ;;  %2240 = vmatprep.mubr.msk.bf16.mxu1 %vm2463_vm1, %v2462_v9 }
 0x536   : > { %v1529_v2 = vpop.f32.mrb[36].mxu0 }
 0x537   : > { %v1583_v3 = vpack.c.bf16 %v1529_v2, %v1529_v2  ;;  %v2212_v4 = vpop.f32.mrb[37].mxu0 }
 0x538   : > { %v1532_v5 = vpop.f32.mrb[38].mxu0 }
 0x539   : > { %v2213_v6 = vpop.f32.mrb[39].mxu0  ;;  %2235 = vmatmul.mubr.msk.bf16.vlgmr.msra.gmra.mrb[44].mxu0 %vm1155_vm2, %v1583_v3  ;;  %v1575_v7 = vpop.f32.mrb[36].mxu1 }
 0x53a   : > { %v1584_v8 = vpack.c.bf16 %v1575_v7, %v1575_v7  ;;  %v2218_v10 = vpop.f32.mrb[37].mxu1 }
 0x53b   : > { %v1578_v11 = vpop.f32.mrb[38].mxu1 }
 0x53c   : > { %v2219_v12 = vpop.f32.mrb[39].mxu1  ;;  %2241 = vmatmul.mubr.msk.bf16.vlgmr.msra.gmra.mrb[44].mxu1 %vm1155_vm2, %v1584_v8 }
 0x53d   : > { %2363 = shalt.err (!%p2360_p5)
}
 0x53e   : > { %s2364_s30 = scalar_lea.hbm %s2847_s12, 512  ;;  %s2368_s24 = scalar_lea.hbm %s2942_s10, 1024 }
 0x53f   : > { %p2365_p6 = scmp.ne.s32.totalorder %s2847_s12, %s2364_s30  ;;  %p2369_p10 = scmp.lt.u32.totalorder %s2847_s12, %s2942_s10 }
 0x540   : > { %p2370_p11 = scmp.lt.u32.totalorder %s2368_s24, %s2364_s30  ;;  %p2372_p13 = scmp.lt.u32.totalorder %s2364_s30, %s2847_s12 }
 0x541   : > { %p2366_p7 = pnand %p2365_p6, %p2563_p4 }
 0x542   : > { %p2371_p12 = por %p2370_p11, %p2369_p10 }
 0x543   : > { %p2367_p9 = pneg %p2366_p7 }
 0x544   : > { %p2373_p0 = por %p2372_p13, %p2371_p12 }
 0x546   : > { %p2374_p1 = pnand %p2373_p0, %p2367_p9 }
 0x548   : > { %2377 = shalt.err (!%p2374_p1)
}
 0x549   : > { %s2465_s20 = smov 128   ;;  %s2466_s27 = smov 8  }
 0x54a   : > { %s2947_s28 = scalar_lea.sflag [#allocation5], %s2781_s22  ;;  %s1953_s19 = sshll.u32 %s2781_s22, 3 }
 0x54b   : > { %2245 = dma.vmem_to_hbm [thread:$0]  (%p2563_p4), %s2842_s29, 512, %s2847_s12, %s2947_s28, %s2465_s20, %s2465_s20, %s2466_s27  }
 0x54c   : > { %s2010_s29 = sshll.u32 %s2452_s16, 7  ;;  %s404_s12 = scalar_lea.vmem [#allocation2], %s1953_s19 }
 0x54d   : > { %s1802_s30 = sshll.u32 %s404_s12, 4  ;;  %s2883_s0 = scalar_lea.hbm %s2941_s9, %s2010_s29  ;;  %s2885_s30 = int_to_ptr.vmem [resolvable:$true] %s1802_s30 }
 0x54e   : > { %s1783_s16 = scalar_lea.sflag [#allocation3], %s2781_s22  ;;  %s2378_s20 = scalar_lea.vmem %s2885_s30, 128 }
 0x54f   : > { %p2379_p2 = scmp.ne.s32.totalorder %s2885_s30, %s2378_s20  ;;  %s2467_s27 = smov [#allocation2]  }
 0x550   : > { %s2382_s28 = sshll.u32 %s2467_s27, 4  ;;  %s2383_s28 = int_to_ptr.vmem [resolvable:$false] %s2382_s28 }
 0x551   : > { %p2380_p3 = pnand %p2379_p2, %p2563_p4  ;;  %s2384_s19 = scalar_lea.vmem %s2383_s28, 256 }
 0x552   : > { %p2385_p6 = scmp.lt.s32.totalorder %s2885_s30, %s2383_s28  ;;  %p2386_p7 = scmp.lt.s32.totalorder %s2384_s19, %s2378_s20 }
 0x553   : > { %p2381_p5 = pneg %p2380_p3 }
 0x554   : > { %p2387_p9 = por %p2386_p7, %p2385_p6 }
 0x556   : > { %p2388_p10 = pnand %p2387_p9, %p2381_p5 }
 0x603   : > { %v1629_v9 = vpop.f32.mrb[40].mxu0 }
 0x604   : > { %v2224_v13 = vpop.f32.mrb[41].mxu0  ;;  %v1773_v17 = vsel %vm431_vm0, %v1629_v9, 0.0 }
 0x605   : > { %v1632_v14 = vpop.f32.mrb[42].mxu0 }
 0x606   : > { %v2225_v15 = vpop.f32.mrb[43].mxu0 }
 0x607   : > { %v1675_v16 = vpop.f32.mrb[40].mxu1 }
 0x608   : > { %v1774_v18 = vsel %vm431_vm0, %v1675_v16, 0.0  ;;  %v2230_v19 = vpop.f32.mrb[41].mxu1 }
 0x609   : > { %v1775_v20 = vadd.f32 %v1774_v18, %v1773_v17  ;;  %v1678_v21 = vpop.f32.mrb[42].mxu1 }
 0x60a   : > { %v2231_v22 = vpop.f32.mrb[43].mxu1 }
 0x60c   : > { %v1721_v23 = vpop.f32.mrb[44].mxu0 }
 0x60d   : > { %v1776_v24 = vsel %vm431_vm0, %v1721_v23, 0.0  ;;  %v2236_v25 = vpop.f32.mrb[45].mxu0 }
 0x60e   : > { %v1777_v26 = vadd.f32 %v1776_v24, %v1775_v20  ;;  %v1724_v27 = vpop.f32.mrb[46].mxu0 }
 0x60f   : > { %v2237_v28 = vpop.f32.mrb[47].mxu0  ;;  %v1767_v29 = vpop.f32.mrb[44].mxu1 }
 0x610   : > { %v1778_v30 = vsel %vm431_vm0, %v1767_v29, 0.0  ;;  %v2242_v31 = vpop.f32.mrb[45].mxu1 }
 0x611   : > { %v1779_v32 = vadd.f32 %v1778_v30, %v1777_v26  ;;  %v1770_v33 = vpop.f32.mrb[46].mxu1 }
 0x612   : > { %v2243_v34 = vpop.f32.mrb[47].mxu1 }
 0x613   : > { %v1780_v35 = vadd.f32 %v1779_v32, %v2586_v0 }
 0x615   : > { %1781 = vst.msk [vmem:[%s404_s12] sm:$0xff] %vm431_vm0, %v1780_v35 }
 0x616   : > { %2391 = shalt.err (!%p2388_p10)
}
 0x617   : > { %s2392_s22 = scalar_lea.hbm %s2883_s0, 128  ;;  %s2396_s11 = scalar_lea.hbm %s2941_s9, 256 }
 0x618   : > { %p2393_p11 = scmp.ne.s32.totalorder %s2883_s0, %s2392_s22  ;;  %p2397_p0 = scmp.lt.u32.totalorder %s2883_s0, %s2941_s9 }
 0x619   : > { %p2398_p1 = scmp.lt.u32.totalorder %s2396_s11, %s2392_s22  ;;  %p2400_p3 = scmp.lt.u32.totalorder %s2392_s22, %s2883_s0 }
 0x61a   : > { %p2394_p12 = pnand %p2393_p11, %p2563_p4 }
 0x61b   : > { %p2399_p2 = por %p2398_p1, %p2397_p0 }
 0x61c   : > { %p2395_p13 = pneg %p2394_p12 }
 0x61d   : > { %p2401_p5 = por %p2400_p3, %p2399_p2 }
 0x61f   : > { %p2402_p6 = pnand %p2401_p5, %p2395_p13 }
 0x621   : > { %2405 = shalt.err (!%p2402_p6)
}
 0x622   : > { %2244 = dma.vmem_to_hbm [thread:$0]  (%p2563_p4), %s2885_s30, 128, %s2883_s0, %s1783_s16  }
 0x623 PF: > { %p2255_p7 = scmp.ge.s32.totalorder %s2460_s18, 2  ;;  %s1831_s20 = sand.u32 1, %s2440_s13  }
 0x624   : > { %s1832_s28 = scalar_lea.sflag [#allocation3], %s1831_s20 }
 0x625   : > { %p2249_p9 = pnand %p2255_p7, %p2570_p8 }
 0x627   : > { %2431 = dma.done.wait (!%p2249_p9), %s1832_s28, 128  }
 0x628   : > { %2433 = vsyncadd (!%p2249_p9), %s1832_s28, 4294967168  ;;  %s1841_s19 = scalar_lea.sflag [#allocation5], %s1831_s20 }
 0x629   : > { %2435 = dma.done.wait (!%p2249_p9), %s1841_s19, 512  }
 0x62a   : > { %2437 = vsyncadd (!%p2249_p9), %s1841_s19, 4294966784  ;;  %s27_s18 = sadd.s32 1, %s2460_s18   ;;  %s2948_s13 = smov %s2444_s14 }
 0x62b   : > { %p24_p10 = scmp.ge.s32.totalorder %s27_s18, 4   ;;  %s2949_s14 = smov %s2448_s15 }
 0x62c   : > { %s2950_s15 = smov %s2576_s26  ;;  %s2951_s16 = smov %s2456_s17 }
 0x62d   : > { %s2952_s17 = smov %s2954_s21  ;;  %26 = sbr.rel (!%p24_p10) target bundleno = 8 (0x8), region = 114 }
 0x634   :  { %1846 = vsyncpa [#allocation3], 1 }
 0x635   :  { %1848 = vsyncpa [#allocation3 + $0x1], 1 }
 0x636   :  { %1849 = vsyncpa [#allocation5], 1 }
 0x637   :  { %1851 = vsyncpa [#allocation5 + $0x1], 1 }

</bundles_post_ra>
